<compile_context>
chip_gen: v6e
topology: v6e:2x2x1
jax: 0.10.0
libtpu: 0.0.40
codegen_flags: <defaults>
</compile_context>

<pallas_src>
import functools

import jax
import jax.numpy as jnp
from jax.experimental import pallas as pl
from jax.experimental.pallas import tpu as pltpu


def _round_up(n, m):
    return ((n + m - 1) // m) * m


def _vmem_limit_bytes():
    # ~75% of physical VMEM per core; leaves headroom for compiler scratch.
    try:
        cap = pltpu.get_tpu_info().vmem_capacity_bytes
        return int(cap) * 3 // 4
    except Exception:
        return 48 * 1024 * 1024  # safe on v5e/v6e (128 MiB) and v7x (64 MiB)


# -----------------------------------------------------------------------------
# Fused kernel: LayerNorm -> FFN (chunked over d_ff) -> residual add.
# Grid: (row tiles ["parallel"], d_ff chunks ["arbitrary" reduction]).
# -----------------------------------------------------------------------------
def _sublayer_ffn_kernel(x_ref, g_ref, b_ref, w1_ref, b1_ref, w2_ref, b2_ref,
                         o_ref, xn_ref, acc_ref, *, eps):
    k = pl.program_id(1)

    @pl.when(k == 0)
    def _():
        # LayerNorm of the resident x tile (annotated-transformer form:
        # unbiased std, eps added to std). Stored once per row tile; reused for
        # every d_ff chunk.
        x = x_ref[...].astype(jnp.float32)
        d = x.shape[-1]
        mean = jnp.mean(x, axis=-1, keepdims=True)
        xc = x - mean
        var = jnp.sum(xc * xc, axis=-1, keepdims=True) / (d - 1)
        inv_std = pl.reciprocal(jnp.sqrt(var) + eps, approx=True)
        xn = (g_ref[...].astype(jnp.float32) * xc * inv_std
              + b_ref[...].astype(jnp.float32))
        xn_ref[...] = xn.astype(xn_ref.dtype)
        acc_ref[...] = jnp.zeros_like(acc_ref)

    # First linear (d_model -> d_ff chunk), bias + ReLU in f32.
    h = jnp.dot(xn_ref[...], w1_ref[...], preferred_element_type=jnp.float32)
    h = jnp.maximum(h + b1_ref[...].astype(jnp.float32), 0.0)

    # Second linear chunk: accumulate the (tm, d_model) partial product in f32.
    acc_ref[...] += jnp.dot(h.astype(w2_ref.dtype), w2_ref[...],
                            preferred_element_type=jnp.float32)

    @pl.when(k == pl.num_programs(1) - 1)
    def _():
        # Finalize: second bias + residual, single store of the output tile.
        o_ref[...] = (acc_ref[...]
                      + b2_ref[...].astype(jnp.float32)
                      + x_ref[...].astype(jnp.float32)).astype(o_ref.dtype)


def sublayer_connection_ffn(x, gamma, beta, w1, b1, w2, b2, *,
                            eps=1e-6, tm=256, tn=512):
    """y = x + relu(LayerNorm(x) @ w1 + b1) @ w2 + b2   (dropout = identity).

    w1: [d_model, d_ff], w2: [d_ff, d_model] (pre-transposed vs. nn.Linear).
    Pass bf16 x/weights for full v6e/v7x MXU throughput; accumulation is f32.
    """
    *lead, d_model = x.shape
    x2d = x.reshape(-1, d_model)
    M = x2d.shape[0]
    d_ff = w1.shape[1]

    budget = _vmem_limit_bytes()
    w_item = jnp.dtype(w1.dtype).itemsize
    x_item = jnp.dtype(x.dtype).itemsize

    # Row tile: big (default 256) to amortize per-grid-step overhead and feed
    # the MXU, clamped to the 16-rounded token count (covers bf16 packing).
    # No padding: the ragged last block's store is masked by Pallas and rows
    # are independent, so the overhang never reaches valid output.
    tm_eff = max(16, min(tm, _round_up(M, 16)))
    n_row_tiles = pl.cdiv(M, tm_eff)

    # d_ff chunk: keep full weights resident when they fit; otherwise halve tn
    # while double-buffered W1+W2 chunks would exceed ~half the VMEM budget.
    # (When chunking, prefer growing tm over tn: weight HBM traffic scales as
    # (M/tm) * sizeof(W1+W2).)
    tn_eff = min(tn, d_ff)
    while (tn_eff > 128 and d_ff % (tn_eff // 2) == 0
           and 2 * (2 * d_model * tn_eff) * w_item > budget // 2):
        tn_eff //= 2
    if d_ff % tn_eff != 0:
        raise ValueError(f"d_ff={d_ff} must be divisible by d_ff chunk size {tn_eff}")
    n_k = d_ff // tn_eff

    # Advisory cost hint (counts weight re-streaming once per row tile).
    cost = pl.CostEstimate(
        flops=4 * M * d_model * d_ff + 8 * M * d_model,
        transcendentals=2 * M,  # sqrt + reciprocal per row
        bytes_accessed=(2 * M * d_model) * x_item
        + n_row_tiles * (2 * d_model * d_ff + d_ff + d_model) * w_item
        + 2 * d_model * jnp.dtype(gamma.dtype).itemsize,
    )

    out = pl.pallas_call(
        functools.partial(_sublayer_ffn_kernel, eps=eps),
        out_shape=jax.ShapeDtypeStruct((M, d_model), x.dtype),
        grid_spec=pltpu.PrefetchScalarGridSpec(
            num_scalar_prefetch=0,
            grid=(n_row_tiles, n_k),
            in_specs=[
                pl.BlockSpec((tm_eff, d_model), lambda i, k: (i, 0)),   # x tile (resident over k)
                pl.BlockSpec((1, d_model), lambda i, k: (0, 0)),        # gamma
                pl.BlockSpec((1, d_model), lambda i, k: (0, 0)),        # beta
                pl.BlockSpec((d_model, tn_eff), lambda i, k: (0, k)),   # W1 chunk
                pl.BlockSpec((1, tn_eff), lambda i, k: (0, k)),         # b1 chunk
                pl.BlockSpec((tn_eff, d_model), lambda i, k: (k, 0)),   # W2 chunk
                pl.BlockSpec((1, d_model), lambda i, k: (0, 0)),        # b2
            ],
            out_specs=pl.BlockSpec((tm_eff, d_model), lambda i, k: (i, 0)),
            scratch_shapes=[
                pltpu.VMEM((tm_eff, d_model), w1.dtype),    # LayerNorm(x) tile
                pltpu.VMEM((tm_eff, d_model), jnp.float32),  # f32 accumulator
            ],
        ),
        compiler_params=pltpu.CompilerParams(
            dimension_semantics=("parallel", "arbitrary"),
            vmem_limit_bytes=budget,
        ),
        cost_estimate=cost,
    )(x2d, gamma.reshape(1, d_model), beta.reshape(1, d_model),
      w1, b1.reshape(1, d_ff), w2, b2.reshape(1, d_model))

    return out.reshape(*lead, d_model)


if __name__ == "__main__":
    # Small but lane-aligned demo shapes (d_model multiple of 128 keeps stores
    # lane-dense and MXU feeds unpadded).
    B, S, d_model, d_ff = 2, 8, 128, 256
    eps = 1e-6

    key = jax.random.PRNGKey(0)
    kx, kg, kb, kw1, kb1, kw2, kb2 = jax.random.split(key, 7)

    x = jax.random.normal(kx, (B, S, d_model), dtype=jnp.float32)
    gamma = 1.0 + 0.1 * jax.random.normal(kg, (d_model,), dtype=jnp.float32)
    beta = 0.1 * jax.random.normal(kb, (d_model,), dtype=jnp.float32)
    w1 = 0.1 * jax.random.normal(kw1, (d_model, d_ff), dtype=jnp.float32)
    b1 = 0.1 * jax.random.normal(kb1, (d_ff,), dtype=jnp.float32)
    w2 = 0.1 * jax.random.normal(kw2, (d_ff, d_model), dtype=jnp.float32)
    b2 = 0.1 * jax.random.normal(kb2, (d_model,), dtype=jnp.float32)

    def reference(xv, gv, bv, w1v, b1v, w2v, b2v):
        xf = xv.astype(jnp.float32)
        mean = xf.mean(-1, keepdims=True)
        xc = xf - mean
        std = jnp.sqrt((xc * xc).sum(-1, keepdims=True) / (d_model - 1))
        normed = gv.astype(jnp.float32) * xc / (std + eps) + bv.astype(jnp.float32)
        h = jnp.maximum(normed @ w1v.astype(jnp.float32) + b1v.astype(jnp.float32), 0.0)
        return xf + (h @ w2v.astype(jnp.float32) + b2v.astype(jnp.float32))

    # Case 1: f32 inputs, tn=128 -> two d_ff chunks (exercises the LN-at-k0 /
    # accumulate / finalize-with-residual path).
    y32 = jax.block_until_ready(
        sublayer_connection_ffn(x, gamma, beta, w1, b1, w2, b2, eps=eps, tn=128))
    ref32 = reference(x, gamma, beta, w1, b1, w2, b2)
    assert y32.shape == (B, S, d_model)
    err32 = float(jnp.max(jnp.abs(y32 - ref32)))
    assert jnp.allclose(y32, ref32, atol=2e-2, rtol=2e-2), f"f32 mismatch: {err32}"

    # Case 2: bf16 inputs (full MXU throughput on v6e/v7x), default tn ->
    # single d_ff chunk, W1/W2 fully VMEM-resident. Accumulation stays f32.
    xb, gb, bb = (a.astype(jnp.bfloat16) for a in (x, gamma, beta))
    w1b, b1b, w2b, b2b = (a.astype(jnp.bfloat16) for a in (w1, b1, w2, b2))
    yb = jax.block_until_ready(
        sublayer_connection_ffn(xb, gb, bb, w1b, b1b, w2b, b2b, eps=eps))
    refb = reference(xb, gb, bb, w1b, b1b, w2b, b2b)
    errb = float(jnp.max(jnp.abs(yb.astype(jnp.float32) - refb)))
    assert jnp.allclose(yb.astype(jnp.float32), refb, atol=1e-1, rtol=1e-1), \
        f"bf16 mismatch: {errb}"

    print("KERNEL_OK")
</pallas_src>

<mosaic_0001>
module attributes {stable_mosaic.version = 11 : i64} {
  func.func @_sublayer_ffn_kernel(%arg0: i32, %arg1: i32, %arg2: memref<16x128xf32, #tpu.memory_space<vmem>>, %arg3: memref<1x128xf32, #tpu.memory_space<vmem>>, %arg4: memref<1x128xf32, #tpu.memory_space<vmem>>, %arg5: memref<128x128xf32, #tpu.memory_space<vmem>>, %arg6: memref<1x128xf32, #tpu.memory_space<vmem>>, %arg7: memref<128x128xf32, #tpu.memory_space<vmem>>, %arg8: memref<1x128xf32, #tpu.memory_space<vmem>>, %arg9: memref<16x128xf32, #tpu.memory_space<vmem>>, %arg10: memref<16x128xf32, #tpu.memory_space<vmem>>, %arg11: memref<16x128xf32, #tpu.memory_space<vmem>>) attributes {dimension_semantics = [#tpu.dimension_semantics<parallel>, #tpu.dimension_semantics<arbitrary>], iteration_bounds = array<i64: 1, 2>, scalar_prefetch = 0 : i64, scratch_operands = 2 : i64, tpu.core_type = #tpu.core_type<tc>, window_params = [{transform_indices = @transform_0, window_bounds = array<i64: 16, 128>}, {pipeline_mode = #tpu.pipeline_mode<synchronous>, transform_indices = @transform_1, window_bounds = array<i64: 1, 128>}, {pipeline_mode = #tpu.pipeline_mode<synchronous>, transform_indices = @transform_2, window_bounds = array<i64: 1, 128>}, {transform_indices = @transform_3, window_bounds = array<i64: 128, 128>}, {transform_indices = @transform_4, window_bounds = array<i64: 1, 128>}, {transform_indices = @transform_5, window_bounds = array<i64: 128, 128>}, {pipeline_mode = #tpu.pipeline_mode<synchronous>, transform_indices = @transform_6, window_bounds = array<i64: 1, 128>}, {transform_indices = @transform_7, window_bounds = array<i64: 16, 128>}]} {
    %c0_i32 = arith.constant 0 : i32
    %0 = arith.cmpi eq, %arg1, %c0_i32 : i32
    %1 = arith.extui %0 : i1 to i32
    %c0_i32_0 = arith.constant 0 : i32
    %2 = arith.cmpi ne, %1, %c0_i32_0 : i32
    scf.if %2 {
      %c0_15 = arith.constant 0 : index
      %c0_16 = arith.constant 0 : index
      %19 = vector.load %arg2[%c0_15, %c0_16] : memref<16x128xf32, #tpu.memory_space<vmem>>, vector<16x128xf32>
      %cst_17 = arith.constant dense<0.000000e+00> : vector<16xf32>
      %20 = vector.multi_reduction <add>, %19, %cst_17 [1] : vector<16x128xf32> to vector<16xf32>
      %21 = vector.shape_cast %20 : vector<16xf32> to vector<16x1xf32>
      %cst_18 = arith.constant 1.280000e+02 : f32
      %22 = vector.broadcast %cst_18 : f32 to vector<16x1xf32>
      %23 = arith.divf %21, %22 : vector<16x1xf32>
      %24 = vector.broadcast %23 : vector<16x1xf32> to vector<16x128xf32>
      %25 = arith.subf %19, %24 : vector<16x128xf32>
      %26 = arith.mulf %25, %25 : vector<16x128xf32>
      %cst_19 = arith.constant dense<0.000000e+00> : vector<16xf32>
      %27 = vector.multi_reduction <add>, %26, %cst_19 [1] : vector<16x128xf32> to vector<16xf32>
      %28 = vector.shape_cast %27 : vector<16xf32> to vector<16x1xf32>
      %cst_20 = arith.constant 1.270000e+02 : f32
      %29 = vector.broadcast %cst_20 : f32 to vector<16x1xf32>
      %30 = arith.divf %28, %29 : vector<16x1xf32>
      %31 = math.sqrt %30 : vector<16x1xf32>
      %cst_21 = arith.constant 9.99999997E-7 : f32
      %32 = vector.broadcast %cst_21 : f32 to vector<16x1xf32>
      %33 = arith.addf %31, %32 : vector<16x1xf32>
      %34 = tpu.reciprocal %33 {approx = true} : vector<16x1xf32> -> vector<16x1xf32>
      %c0_22 = arith.constant 0 : index
      %c0_23 = arith.constant 0 : index
      %35 = vector.load %arg3[%c0_22, %c0_23] : memref<1x128xf32, #tpu.memory_space<vmem>>, vector<1x128xf32>
      %36 = vector.broadcast %35 : vector<1x128xf32> to vector<16x128xf32>
      %37 = arith.mulf %36, %25 : vector<16x128xf32>
      %38 = vector.broadcast %34 : vector<16x1xf32> to vector<16x128xf32>
      %39 = arith.mulf %37, %38 : vector<16x128xf32>
      %c0_24 = arith.constant 0 : index
      %c0_25 = arith.constant 0 : index
      %40 = vector.load %arg4[%c0_24, %c0_25] : memref<1x128xf32, #tpu.memory_space<vmem>>, vector<1x128xf32>
      %41 = vector.broadcast %40 : vector<1x128xf32> to vector<16x128xf32>
      %42 = arith.addf %39, %41 : vector<16x128xf32>
      %c0_26 = arith.constant 0 : index
      %c0_27 = arith.constant 0 : index
      %43 = vector.load %arg10[%c0_26, %c0_27] : memref<16x128xf32, #tpu.memory_space<vmem>>, vector<16x128xf32>
      tpu.vector_store %arg10[%c0_26, %c0_27], %42 {strides = array<i32>} : memref<16x128xf32, #tpu.memory_space<vmem>>, vector<16x128xf32>,
      %cst_28 = arith.constant 0.000000e+00 : f32
      %44 = vector.broadcast %cst_28 : f32 to vector<16x128xf32>
      %c0_29 = arith.constant 0 : index
      %c0_30 = arith.constant 0 : index
      %45 = vector.load %arg11[%c0_29, %c0_30] : memref<16x128xf32, #tpu.memory_space<vmem>>, vector<16x128xf32>
      tpu.vector_store %arg11[%c0_29, %c0_30], %44 {strides = array<i32>} : memref<16x128xf32, #tpu.memory_space<vmem>>, vector<16x128xf32>,
    } else {
    }
    %c0 = arith.constant 0 : index
    %c0_1 = arith.constant 0 : index
    %3 = vector.load %arg10[%c0, %c0_1] : memref<16x128xf32, #tpu.memory_space<vmem>>, vector<16x128xf32>
    %c0_2 = arith.constant 0 : index
    %c0_3 = arith.constant 0 : index
    %4 = vector.load %arg5[%c0_2, %c0_3] : memref<128x128xf32, #tpu.memory_space<vmem>>, vector<128x128xf32>
    %cst = arith.constant dense<0.000000e+00> : vector<16x128xf32>
    %5 = tpu.matmul %3, %4, %cst {dimension_numbers = #tpu.dot_dimension_numbers<[1], [0], [0], [1], [0, 0, 1, 1], [], []>} : vector<16x128xf32>, vector<128x128xf32>, vector<16x128xf32> -> vector<16x128xf32>
    %c0_4 = arith.constant 0 : index
    %c0_5 = arith.constant 0 : index
    %6 = vector.load %arg6[%c0_4, %c0_5] : memref<1x128xf32, #tpu.memory_space<vmem>>, vector<1x128xf32>
    %7 = vector.broadcast %6 : vector<1x128xf32> to vector<16x128xf32>
    %8 = arith.addf %5, %7 : vector<16x128xf32>
    %cst_6 = arith.constant 0.000000e+00 : f32
    %9 = vector.broadcast %cst_6 : f32 to vector<16x128xf32>
    %10 = arith.maximumf %8, %9 : vector<16x128xf32>
    %c0_7 = arith.constant 0 : index
    %c0_8 = arith.constant 0 : index
    %11 = vector.load %arg11[%c0_7, %c0_8] : memref<16x128xf32, #tpu.memory_space<vmem>>, vector<16x128xf32>
    %c0_9 = arith.constant 0 : index
    %c0_10 = arith.constant 0 : index
    %12 = vector.load %arg7[%c0_9, %c0_10] : memref<128x128xf32, #tpu.memory_space<vmem>>, vector<128x128xf32>
    %cst_11 = arith.constant dense<0.000000e+00> : vector<16x128xf32>
    %13 = tpu.matmul %10, %12, %cst_11 {dimension_numbers = #tpu.dot_dimension_numbers<[1], [0], [0], [1], [0, 0, 1, 1], [], []>} : vector<16x128xf32>, vector<128x128xf32>, vector<16x128xf32> -> vector<16x128xf32>
    %14 = arith.addf %11, %13 : vector<16x128xf32>
    %c0_12 = arith.constant 0 : index
    %c0_13 = arith.constant 0 : index
    %15 = vector.load %arg11[%c0_12, %c0_13] : memref<16x128xf32, #tpu.memory_space<vmem>>, vector<16x128xf32>
    tpu.vector_store %arg11[%c0_12, %c0_13], %14 {strides = array<i32>} : memref<16x128xf32, #tpu.memory_space<vmem>>, vector<16x128xf32>,
    %c1_i32 = arith.constant 1 : i32
    %16 = arith.cmpi eq, %arg1, %c1_i32 : i32
    %17 = arith.extui %16 : i1 to i32
    %c0_i32_14 = arith.constant 0 : i32
    %18 = arith.cmpi ne, %17, %c0_i32_14 : i32
    scf.if %18 {
      %c0_15 = arith.constant 0 : index
      %c0_16 = arith.constant 0 : index
      %19 = vector.load %arg11[%c0_15, %c0_16] : memref<16x128xf32, #tpu.memory_space<vmem>>, vector<16x128xf32>
      %c0_17 = arith.constant 0 : index
      %c0_18 = arith.constant 0 : index
      %20 = vector.load %arg8[%c0_17, %c0_18] : memref<1x128xf32, #tpu.memory_space<vmem>>, vector<1x128xf32>
      %21 = vector.broadcast %20 : vector<1x128xf32> to vector<16x128xf32>
      %22 = arith.addf %19, %21 : vector<16x128xf32>
      %c0_19 = arith.constant 0 : index
      %c0_20 = arith.constant 0 : index
      %23 = vector.load %arg2[%c0_19, %c0_20] : memref<16x128xf32, #tpu.memory_space<vmem>>, vector<16x128xf32>
      %24 = arith.addf %22, %23 : vector<16x128xf32>
      %c0_21 = arith.constant 0 : index
      %c0_22 = arith.constant 0 : index
      %25 = vector.load %arg9[%c0_21, %c0_22] : memref<16x128xf32, #tpu.memory_space<vmem>>, vector<16x128xf32>
      tpu.vector_store %arg9[%c0_21, %c0_22], %24 {strides = array<i32>} : memref<16x128xf32, #tpu.memory_space<vmem>>, vector<16x128xf32>,
    } else {
    }
    return
  }
  func.func @transform_0(%arg0: i32, %arg1: i32) -> (i32, i32) {
    %c0_i32 = arith.constant 0 : i32
    %c0_i32_0 = arith.constant 0 : i32
    return %arg0, %c0_i32 : i32, i32
  }
  func.func @transform_1(%arg0: i32, %arg1: i32) -> (i32, i32) {
    %c0_i32 = arith.constant 0 : i32
    %c0_i32_0 = arith.constant 0 : i32
    %c0_i32_1 = arith.constant 0 : i32
    return %c0_i32, %c0_i32_0 : i32, i32
  }
  func.func @transform_2(%arg0: i32, %arg1: i32) -> (i32, i32) {
    %c0_i32 = arith.constant 0 : i32
    %c0_i32_0 = arith.constant 0 : i32
    %c0_i32_1 = arith.constant 0 : i32
    return %c0_i32, %c0_i32_0 : i32, i32
  }
  func.func @transform_3(%arg0: i32, %arg1: i32) -> (i32, i32) {
    %c0_i32 = arith.constant 0 : i32
    %c0_i32_0 = arith.constant 0 : i32
    return %c0_i32, %arg1 : i32, i32
  }
  func.func @transform_4(%arg0: i32, %arg1: i32) -> (i32, i32) {
    %c0_i32 = arith.constant 0 : i32
    %c0_i32_0 = arith.constant 0 : i32
    return %c0_i32, %arg1 : i32, i32
  }
  func.func @transform_5(%arg0: i32, %arg1: i32) -> (i32, i32) {
    %c0_i32 = arith.constant 0 : i32
    %c0_i32_0 = arith.constant 0 : i32
    return %arg1, %c0_i32 : i32, i32
  }
  func.func @transform_6(%arg0: i32, %arg1: i32) -> (i32, i32) {
    %c0_i32 = arith.constant 0 : i32
    %c0_i32_0 = arith.constant 0 : i32
    %c0_i32_1 = arith.constant 0 : i32
    return %c0_i32, %c0_i32_0 : i32, i32
  }
  func.func @transform_7(%arg0: i32, %arg1: i32) -> (i32, i32) {
    %c0_i32 = arith.constant 0 : i32
    %c0_i32_0 = arith.constant 0 : i32
    return %arg0, %c0_i32 : i32, i32
  }
}

</mosaic_0001>

<bundles_post_ra>
// kernel: tpu_custom_call.1
= control target key start
LH: loop header
LB: loop body
LE: loop exit
PB: predicated region body
PF: predicated region fallthrough
CT: control target
= control target key end

     0   :  { %s1512_s0 = inlined_call_operand.hbm [shape: f32[16,128], index: 0, kind: input, shape index: {}]   ;;  %s1513_s1 = inlined_call_operand.vmem [shape: f32[1,128], index: 1, kind: input, shape index: {}]   ;;  %s1514_s2 = inlined_call_operand.hbm [shape: f32[1,128], index: 2, kind: input, shape index: {}]   ;;  %s1515_s3 = inlined_call_operand.hbm [shape: f32[128,256], index: 3, kind: input, shape index: {}]   ;;  %s1516_s4 = inlined_call_operand.vmem [shape: f32[1,256], index: 4, kind: input, shape index: {}]   ;;  %s1517_s5 = inlined_call_operand.hbm [shape: f32[256,128], index: 5, kind: input, shape index: {}]   ;;  %s1518_s6 = inlined_call_operand.vmem [shape: f32[1,128], index: 6, kind: input, shape index: {}]   ;;  %s1519_s7 = inlined_call_operand.hbm [shape: f32[16,128], index: 7, kind: output, shape index: {}]  }
   0x1   :  { %1526 = sst [smem:[#allocation17_spill]] %s1512_s0 }
   0x2   :  { %1527 = sst [smem:[#allocation18_spill]] %s1515_s3 }
   0x3   :  { %1528 = sst [smem:[#allocation19_spill]] %s1519_s7 }
   0x4   :  { %12 = vsyncpa [#allocation5], 0 }
   0x5   :  { %13 = vsyncpa [#allocation8], 0 }
   0x6   :  { %14 = vsyncpa [#allocation6], 0  ;;  %s1278_s24 = smov 0   ;;  %s1280_s25 = smov 0  }
   0x7   :  { %s1282_s26 = smov 0   ;;  %s1284_s27 = smov 0  }
   0x8   :  { %s1286_s28 = smov 0   ;;  %s1288_s29 = smov 0  }
   0x9 LB: > { %s1307_s30 = sadd.s32 4294967295, %s1225_s29   ;;  %p114_p0 = scmp.ne.s32.totalorder %s1213_s26, %s1209_s25  ;;  %s1225_s29 = sphi %s1288_s29, %s20_s29   ;;  %s1221_s28 = sphi %s1286_s28, %s1549_s28   ;;  %s1217_s27 = sphi %s1284_s27, %s1548_s27   ;;  %s1213_s26 = sphi %s1282_s26, %s1547_s26   ;;  %s1209_s25 = sphi %s1280_s25, %s1546_s25   ;;  %s1205_s24 = sphi %s1278_s24, %s1545_s24  }
   0xa   : > { %p115_p1 = scmp.eq.s32.totalorder %s1225_s29, 0  ;;  %p120_p2 = scmp.ne.s32.totalorder %s1209_s25, %s1205_s24 }
   0xb   : > { %p1520_p3 = scmp.eq.s32.totalorder %s1307_s30, 0  ;;  %p798_p5 = scmp.ge.s32.totalorder %s1225_s29, 1 }
   0xc   : > { %p116_p4 = por %p115_p1, %p114_p0  ;;  %p230_p7 = scmp.lt.s32.totalorder %s1225_s29, 3 }
   0xd   : > { %p1318_p6 = por %p1520_p3, %p120_p2  ;;  %s1227_s11 = smov [#allocation4]  }
   0xe   : > { %p1323_p8 = pnand %p798_p5, %p230_p7  ;;  %s245_s12 = sshll.u32 %s1227_s11, 4  ;;  %s246_s12 = int_to_ptr.vmem [resolvable:$true] %s245_s12 }
   0xf   : > { %p961_p10 = scmp.lt.s32.totalorder %s1225_s29, 2  ;;  %s29_s15 = sadd.s32 1, %s1221_s28 }
  0x10   : > { %p945_p9 = pneg %p1323_p8  ;;  %s1042_s16 = scalar_lea.vmem %s246_s12, 256 }
  0x11   : > { %p1336_p12 = pnand %p961_p10, %p116_p4  ;;  %p1043_p0 = scmp.ne.s32.totalorder %s246_s12, %s1042_s16 }
  0x12   : > { %p1332_p11 = pnand %p945_p9, %p1520_p3  ;;  %p1050_p5 = scmp.lt.s32.totalorder %s246_s12, %s246_s12 }
  0x13   : > { %p1051_p7 = scmp.lt.s32.totalorder %s1042_s16, %s1042_s16 }
  0x14   : > { %p1033_p13 = pneg %p1332_p11 }
  0x15   : > { %p1052_p9 = por %p1051_p7, %p1050_p5 }
  0x16   : > { %p1045_p1 = pnand %p1043_p0, %p1033_p13 }
  0x18   : > { %p1046_p2 = pneg %p1045_p1 }
  0x1a   : > { %p1053_p3 = pnand %p1052_p9, %p1046_p2 }
  0x1c   : > { %1056 = shalt.err (!%p1053_p3)
}
  0x1d   : > { %s1521_s17 = smov 128   ;;  %s1523_s18 = smov 8  }
  0x1e   : > { %s1533_s0 = sld [smem:[#allocation17_spill]]  ;;  %p30_p4 = scmp.ge.s32.totalorder %s29_s15, 2 }
  0x1f   : > { %s276_s21 = sand.u32 1, %s1225_s29   ;;  %s278_s22 = sand.u32 1, %s1213_s26  }
  0x20   : > { %s1551_s15 = smov (%p30_p4, %s29_s15), 0  ;;  %s1358_s23 = sshll.u32 %s278_s22, 7 }
  0x21   : > { %1534 = sst [smem:[#allocation16_spill]] %s1551_s15  ;;  %s104_s24 = ssub.s32 %s1221_s28, %s1551_s15 }
  0x22   : > { %p105_p3 = scmp.eq.s32.totalorder %s104_s24, 0  ;;  %s803_s11 = sshll.u32 %s1221_s28, 7 }
  0x23   : > { %s1535_s3 = sld [smem:[#allocation18_spill]]  ;;  %s280_s19 = scalar_lea.vmem [#allocation9], %s1358_s23 }
  0x24   : > { %948 = dma.hbm_to_vmem [thread:$0]  (!%p1332_p11), %s1533_s0, 256, %s246_s12, [#allocation5], %s1521_s17, %s1521_s17, %s1523_s18  }
  0x25   : > { %s286_s20 = sshll.u32 %s280_s19, 4  ;;  %s1536_s12 = sadd.s32 1, %s1213_s26  ;;  %s287_s20 = int_to_ptr.vmem [resolvable:$true] %s286_s20 }
  0x26   : > { %s1370_s17 = scalar_select %p105_p3, %s1213_s26, %s1536_s12  }
  0x27   : > { %s1372_s18 = scalar_lea.sflag [#allocation5], %s276_s21  ;;  %p1059_p10 = pneg %p1336_p12 }
  0x28   : > { %s1070_s22 = scalar_lea.vmem %s287_s20, 2048  ;;  %s1230_s24 = smov [#allocation9]  }
  0x29   : > { %s285_s7 = scalar_lea.hbm %s1535_s3, %s803_s11  ;;  %p1071_p0 = scmp.ne.s32.totalorder %s287_s20, %s1070_s22 }
  0x2a   : > { %s1075_s0 = sshll.u32 %s1230_s24, 4  ;;  %s1076_s0 = int_to_ptr.vmem [resolvable:$false] %s1075_s0 }
  0x2b   : > { %p1073_p1 = pnand %p1071_p0, %p1059_p10  ;;  %s1077_s8 = scalar_lea.vmem %s1076_s0, 4096 }
  0x2c   : > { %p1078_p5 = scmp.lt.s32.totalorder %s287_s20, %s1076_s0  ;;  %p1079_p7 = scmp.lt.s32.totalorder %s1077_s8, %s1070_s22 }
  0x2d   : > { %p1074_p2 = pneg %p1073_p1 }
  0x2e   : > { %p1080_p9 = por %p1079_p7, %p1078_p5 }
  0x30   : > { %p1081_p4 = pnand %p1080_p9, %p1074_p2 }
  0x32   : > { %1084 = shalt.err (!%p1081_p4)
}
  0x33   : > { %s1231_s11 = smov 256   ;;  %s1537_s21 = smov 8  }
  0x34   : > { %s1538_s16 = smov 128   ;;  %s1232_s19 = smov [#allocation7]  }
  0x35   : > { %955 = dma.hbm_to_vmem [thread:$0]  (!%p1336_p12), %s285_s7, 2048, %s287_s20, %s1372_s18, %s1231_s11, %s1538_s16, %s1537_s21  }
  0x36   : > { %s262_s12 = sshll.u32 %s1232_s19, 4  ;;  %s822_s3 = sshll.u32 %s1221_s28, 11  ;;  %s263_s12 = int_to_ptr.vmem [resolvable:$true] %s262_s12 }
  0x37   : > { %s1388_s0 = scalar_lea.hbm %s1517_s5, %s822_s3  ;;  %s1096_s22 = scalar_lea.vmem %s263_s12, 16 }
  0x38   : > { %p1097_p3 = scmp.ne.s32.totalorder %s263_s12, %s1096_s22  ;;  %s1103_s8 = scalar_lea.vmem %s263_s12, 32 }
  0x39   : > { %p1104_p2 = scmp.lt.s32.totalorder %s263_s12, %s263_s12  ;;  %p1105_p5 = scmp.lt.s32.totalorder %s1103_s8, %s1096_s22 }
  0x3a   : > { %p1099_p0 = pnand %p1097_p3, %p1033_p13 }
  0x3b   : > { %p1106_p7 = por %p1105_p5, %p1104_p2 }
  0x3c   : > { %p1100_p1 = pneg %p1099_p0 }
  0x3e   : > { %p1107_p9 = pnand %p1106_p7, %p1100_p1 }
  0x40   : > { %1110 = shalt.err (!%p1107_p9)
}
  0x41   : > { %951 = dma.hbm_to_vmem [thread:$0]  (!%p1332_p11), %s1514_s2, 16, %s263_s12, [#allocation8]  }
  0x42   : > { %s306_s3 = scalar_lea.vmem [#allocation10], %s1358_s23  ;;  %s1233_s19 = smov [#allocation10]  }
  0x43   : > { %s313_s15 = sshll.u32 %s306_s3, 4  ;;  %s1129_s24 = sshll.u32 %s1233_s19, 4  ;;  %s314_s15 = int_to_ptr.vmem [resolvable:$true] %s313_s15  ;;  %s1130_s24 = int_to_ptr.vmem [resolvable:$false] %s1129_s24 }
  0x44   : > { %s1124_s11 = scalar_lea.vmem %s314_s15, 2048  ;;  %s1131_s22 = scalar_lea.vmem %s1130_s24, 4096 }
  0x45   : > { %p1125_p13 = scmp.ne.s32.totalorder %s314_s15, %s1124_s11  ;;  %p1132_p0 = scmp.lt.s32.totalorder %s314_s15, %s1130_s24 }
  0x46   : > { %p1133_p1 = scmp.lt.s32.totalorder %s1131_s22, %s1124_s11 }
  0x47   : > { %p1127_p4 = pnand %p1125_p13, %p1059_p10 }
  0x48   : > { %p1134_p2 = por %p1133_p1, %p1132_p0 }
  0x49   : > { %p1128_p3 = pneg %p1127_p4 }
  0x4b   : > { %p1135_p5 = pnand %p1134_p2, %p1128_p3 }
  0x4d   : > { %1138 = shalt.err (!%p1135_p5)
}
  0x4e   : > { %958 = dma.hbm_to_vmem [thread:$0]  (!%p1336_p12), %s1388_s0, 2048, %s314_s15, %s1372_s18, %s1538_s16, %s1538_s16, %s1537_s21  }
  0x4f   : > { %325 = sbr.rel (%p1323_p8) target bundleno = 894 (0x37e), region = 48  ;;  %p1539_p11 = scmp.eq.s32.totalorder (!%p1323_p8), %s1307_s30, 0 }
  0x54   : > { %1188 = dma.done.wait (%p1539_p11), [#allocation5], 256   ;;  %p1540_p10 = pmov %p1539_p11 }
  0x56   : > { %1190 = vsyncadd (%p1540_p10), [#allocation5], 4294967040  ;;  %p1541_p7 = pmov %p1540_p10 }
  0x58   : > { %1192 = dma.done.wait (%p1541_p7), [#allocation8], 16   ;;  %p1542_p9 = pmov %p1541_p7 }
  0x59   : > { %s335_s13 = sand.u32 1, %s1307_s30   ;;  %s337_s14 = sand.u32 1, %s1209_s25  }
  0x5a   : > { %1194 = vsyncadd (%p1542_p9), [#allocation8], 4294967280  ;;  %s810_s18 = sshll.u32 %s337_s14, 7  ;;  %s336_s10 = scalar_lea.sflag [#allocation5], %s335_s13 }
  0x5b   : > { %s1421_s23 = scalar_lea.vmem [#allocation9], %s810_s18 }
  0x5c   : > { %1196 = dma.done.wait (%p1318_p6), %s336_s10, 4096  }
  0x5d   : > { %1198 = vsyncadd (%p1318_p6), %s336_s10, 4294963200  ;;  %p383_p8 = scmp.lt.s32.totalorder %s1217_s27, 1  ;;  %s1435_s8 = scalar_lea.vmem [#allocation10], %s810_s18 }
  0x5e   : > { %p812_p12 = scmp.ne.s32.totalorder %s1217_s27, 0 }
  0x5f   : > { %s1429_s21 = scalar_select %p383_p8, %s1217_s27, 1 }
  0x60   : > { %391 = sbr.rel (%p812_p12) target bundleno = 429 (0x1ad), region = 68 }
  0x61   : > { %s385_s0 = scalar_lea.vmem %s1516_s4, %s1429_s21 }
  0x65   : > { %v392_v0 = vld [vmem:[#allocation4] sm:$0xff]  ;;  %v393_v1 = vld [vmem:[#allocation4 + $0x8] sm:$0xff]  ;;  %v1234_v10 = vmov 0.0   ;;  %v814_v30 = vld [vmem:[#allocation7] ss:$0 sm:$0xff] }
  0x66   : > { %394 = vadd.xlane.f32.xlu0 %v392_v0  ;;  %452 = vst [vmem:[#allocation3 + $0x8] sm:$0xff] %v1234_v10  ;;  %453 = vst [vmem:[#allocation3] sm:$0xff] %v1234_v10  ;;  %v813_v27 = vld [vmem:[%s1513_s1] ss:$0 sm:$0xff] }
  0x6a   : > { %396 = vadd.xlane.f32.xlu0 %v393_v1 }
  0xef   : > { %v395_v2 = vpop.xlane.xlu0 %394 }
  0xf0   : > { %v399_v3 = vmul.f32 0.0078125, %v395_v2 }
  0xf2   : > { %v401_v4 = vsub.f32 %v392_v0, %v399_v3 }
  0xf3   : > { %v397_v5 = vpop.xlane.xlu0 %396 }
  0xf4   : > { %v400_v6 = vmul.f32 0.0078125, %v397_v5  ;;  %v403_v7 = vmul.f32 %v401_v4, %v401_v4  ;;  %v437_v28 = vmul.f32 %v813_v27, %v401_v4 }
  0xf6   : > { %v402_v8 = vsub.f32 %v393_v1, %v400_v6  ;;  %405 = vadd.xlane.f32.xlu1 %v403_v7 }
  0xf8   : > { %v404_v9 = vmul.f32 %v402_v8, %v402_v8  ;;  %v438_v32 = vmul.f32 %v813_v27, %v402_v8 }
  0xfa   : > { %407 = vadd.xlane.f32.xlu1 %v404_v9 }
 0x17f   : > { %v406_v11 = vpop.xlane.xlu1 %405 }
 0x180   : > { %v410_v12 = vmul.f32 0.007874016, %v406_v11 }
 0x182   : > { %1023 = vrsqrt.f32 %v410_v12  ;;  %vm414_vm0 = vcmp.eq.f32.partialorder %v410_v12, inf  ;;  %v417_v17 = vand.u32 2147483648, %v410_v12  ;;  %vm416_vm1 = vcmp.eq.f32.partialorder %v410_v12, 0.0 }
 0x183   : > { %v408_v13 = vpop.xlane.xlu1 %407 }
 0x184   : > { %v411_v14 = vmul.f32 0.007874016, %v408_v13 }
 0x186   : > { %1025 = vrsqrt.f32 %v411_v14  ;;  %vm421_vm2 = vcmp.eq.f32.partialorder %v411_v14, inf  ;;  %v424_v23 = vand.u32 2147483648, %v411_v14  ;;  %vm423_vm3 = vcmp.eq.f32.partialorder %v411_v14, 0.0 }
 0x18f   : > { %v1024_v15 = vpop.eup %1023 }
 0x190   : > { %v413_v16 = vmul.f32 %v1024_v15, %v410_v12 }
 0x192   : > { %v415_v18 = vsel %vm414_vm0, %v410_v12, %v413_v16 }
 0x193   : > { %v1026_v19 = vpop.eup %1025  ;;  %v418_v20 = vsel %vm416_vm1, %v417_v17, %v415_v18 }
 0x194   : > { %v426_v21 = vadd.f32 1e-06, %v418_v20  ;;  %v420_v22 = vmul.f32 %v1026_v19, %v411_v14 }
 0x196   : > { %1027 = vrcp.f32 %v426_v21  ;;  %v422_v24 = vsel %vm421_vm2, %v411_v14, %v420_v22 }
 0x197   : > { %v425_v25 = vsel %vm423_vm3, %v424_v23, %v422_v24 }
 0x198   : > { %v427_v26 = vadd.f32 1e-06, %v425_v25 }
 0x19a   : > { %1029 = vrcp.f32 %v427_v26 }
 0x1a3   : > { %v1028_v29 = vpop.eup %1027 }
 0x1a4   : > { %v439_v31 = vmul.f32 %v1028_v29, %v437_v28 }
 0x1a6   : > { %v448_v33 = vadd.f32 %v814_v30, %v439_v31 }
 0x1a7   : > { %v1030_v34 = vpop.eup %1029 }
 0x1a8   : > { %450 = vst [vmem:[#allocation2] sm:$0xff] %v448_v33  ;;  %v440_v35 = vmul.f32 %v1030_v34, %v438_v32 }
 0x1aa   : > { %v449_v36 = vadd.f32 %v814_v30, %v440_v35 }
 0x1ac   : > { %451 = vst [vmem:[#allocation2 + $0x8] sm:$0xff] %v449_v36 }
 0x1ad PF: > { %v471_v37 = vld [vmem:[%s1421_s23 + $0x78] sm:$0xff]  ;;  %v470_v38 = vld [vmem:[%s1421_s23 + $0x70] sm:$0xff]  ;;  %v469_v39 = vld [vmem:[%s1421_s23 + $0x68] sm:$0xff]  ;;  %p816_p6 = scmp.ne.s32.totalorder %s1217_s27, 1 }
 0x1ae   : > { %859 = vmatprep.subr.mxu0 %v471_v37  ;;  %v468_v40 = vld [vmem:[%s1421_s23 + $0x60] sm:$0xff]  ;;  %v467_v42 = vld [vmem:[%s1421_s23 + $0x58] sm:$0xff]  ;;  %v572_v44 = vld [vmem:[%s1435_s8 + $0x70] sm:$0xff] }
 0x1af   : > { %860 = vmatpush3.msra.mxu0 %v471_v37  ;;  %v454_v41 = vld [vmem:[#allocation2] sm:$0xff]  ;;  %v573_v43 = vld [vmem:[%s1435_s8 + $0x78] sm:$0xff]  ;;  %v570_v48 = vld [vmem:[%s1435_s8 + $0x60] sm:$0xff] }
 0x1b0   : > { %861 = vmatprep.subr.mxu0 %v470_v38  ;;  %891 = vmatprep.mubr.f32.mxu0 %v454_v41  ;;  %v466_v45 = vld [vmem:[%s1421_s23 + $0x50] sm:$0xff]  ;;  %v571_v46 = vld [vmem:[%s1435_s8 + $0x68] sm:$0xff]  ;;  %v464_v49 = vld [vmem:[%s1421_s23 + $0x40] sm:$0xff] }
 0x1b1   : > { %862 = vmatpush3.msra.mxu0 %v470_v38  ;;  %894 = vmatprep.subr.mxu1 %v573_v43  ;;  %v465_v47 = vld [vmem:[%s1421_s23 + $0x48] sm:$0xff]  ;;  %v569_v50 = vld [vmem:[%s1435_s8 + $0x58] sm:$0xff]  ;;  %v568_v52 = vld [vmem:[%s1435_s8 + $0x50] sm:$0xff] }
 0x1b2   : > { %863 = vmatprep.subr.mxu0 %v469_v39  ;;  %895 = vmatpush3.msra.mxu1 %v573_v43  ;;  %v463_v51 = vld [vmem:[%s1421_s23 + $0x38] sm:$0xff]  ;;  %v462_v53 = vld [vmem:[%s1421_s23 + $0x30] sm:$0xff]  ;;  %v567_v54 = vld [vmem:[%s1435_s8 + $0x48] sm:$0xff] }
 0x1b3   : > { %864 = vmatpush3.msra.mxu0 %v469_v39  ;;  %896 = vmatprep.subr.mxu1 %v572_v44  ;;  %v461_v55 = vld [vmem:[%s1421_s23 + $0x28] sm:$0xff]  ;;  %v566_v56 = vld [vmem:[%s1435_s8 + $0x40] sm:$0xff]  ;;  %v565_v58 = vld [vmem:[%s1435_s8 + $0x38] sm:$0xff] }
 0x1b4   : > { %865 = vmatprep.subr.mxu0 %v468_v40  ;;  %897 = vmatpush3.msra.mxu1 %v572_v44  ;;  %v460_v57 = vld [vmem:[%s1421_s23 + $0x20] sm:$0xff]  ;;  %v459_v59 = vld [vmem:[%s1421_s23 + $0x18] sm:$0xff]  ;;  %v564_v60 = vld [vmem:[%s1435_s8 + $0x30] sm:$0xff] }
 0x1b5   : > { %866 = vmatpush3.msra.mxu0 %v468_v40  ;;  %898 = vmatprep.subr.mxu1 %v571_v46  ;;  %v458_v61 = vld [vmem:[%s1421_s23 + $0x10] sm:$0xff]  ;;  %v563_v62 = vld [vmem:[%s1435_s8 + $0x28] sm:$0xff]  ;;  %v562_v0 = vld [vmem:[%s1435_s8 + $0x20] sm:$0xff] }
 0x1b6   : > { %867 = vmatprep.subr.mxu0 %v467_v42  ;;  %899 = vmatpush3.msra.mxu1 %v571_v46  ;;  %v457_v63 = vld [vmem:[%s1421_s23 + $0x8] sm:$0xff]  ;;  %v456_v1 = vld [vmem:[%s1421_s23] sm:$0xff]  ;;  %v455_v2 = vld [vmem:[#allocation2 + $0x8] sm:$0xff] }
 0x1b7   : > { %868 = vmatpush3.msra.mxu0 %v467_v42  ;;  %900 = vmatprep.subr.mxu1 %v570_v48  ;;  %v561_v3 = vld [vmem:[%s1435_s8 + $0x18] sm:$0xff]  ;;  %v560_v4 = vld [vmem:[%s1435_s8 + $0x10] sm:$0xff]  ;;  %v559_v5 = vld [vmem:[%s1435_s8 + $0x8] sm:$0xff] }
 0x1b8   : > { %869 = vmatprep.subr.mxu0 %v466_v45  ;;  %901 = vmatpush3.msra.mxu1 %v570_v48  ;;  %v558_v6 = vld [vmem:[%s1435_s8] sm:$0xff]  ;;  %v815_v7 = vld [vmem:[%s385_s0] ss:$0 sm:$0xff] }
 0x1b9   : > { %870 = vmatpush3.msra.mxu0 %v466_v45  ;;  %902 = vmatprep.subr.mxu1 %v569_v50  ;;  %v557_v14 = vld [vmem:[#allocation3] sm:$0xff]  ;;  %v556_v16 = vld [vmem:[#allocation3 + $0x8] sm:$0xff] }
 0x1ba   : > { %871 = vmatprep.subr.mxu0 %v465_v47  ;;  %903 = vmatpush3.msra.mxu1 %v569_v50 }
 0x1bb   : > { %872 = vmatpush3.msra.mxu0 %v465_v47  ;;  %904 = vmatprep.subr.mxu1 %v568_v52 }
 0x1bc   : > { %873 = vmatprep.subr.mxu0 %v464_v49  ;;  %905 = vmatpush3.msra.mxu1 %v568_v52 }
 0x1bd   : > { %874 = vmatpush3.msra.mxu0 %v464_v49  ;;  %906 = vmatprep.subr.mxu1 %v567_v54 }
 0x1be   : > { %875 = vmatprep.subr.mxu0 %v463_v51  ;;  %907 = vmatpush3.msra.mxu1 %v567_v54 }
 0x1bf   : > { %876 = vmatpush3.msra.mxu0 %v463_v51  ;;  %908 = vmatprep.subr.mxu1 %v566_v56 }
 0x1c0   : > { %877 = vmatprep.subr.mxu0 %v462_v53  ;;  %909 = vmatpush3.msra.mxu1 %v566_v56 }
 0x1c1   : > { %878 = vmatpush3.msra.mxu0 %v462_v53  ;;  %910 = vmatprep.subr.mxu1 %v565_v58 }
 0x1c2   : > { %879 = vmatprep.subr.mxu0 %v461_v55  ;;  %911 = vmatpush3.msra.mxu1 %v565_v58 }
 0x1c3   : > { %880 = vmatpush3.msra.mxu0 %v461_v55  ;;  %912 = vmatprep.subr.mxu1 %v564_v60 }
 0x1c4   : > { %881 = vmatprep.subr.mxu0 %v460_v57  ;;  %913 = vmatpush3.msra.mxu1 %v564_v60 }
 0x1c5   : > { %882 = vmatpush3.msra.mxu0 %v460_v57  ;;  %914 = vmatprep.subr.mxu1 %v563_v62 }
 0x1c6   : > { %883 = vmatprep.subr.mxu0 %v459_v59  ;;  %915 = vmatpush3.msra.mxu1 %v563_v62 }
 0x1c7   : > { %884 = vmatpush3.msra.mxu0 %v459_v59  ;;  %916 = vmatprep.subr.mxu1 %v562_v0 }
 0x1c8   : > { %885 = vmatprep.subr.mxu0 %v458_v61  ;;  %917 = vmatpush3.msra.mxu1 %v562_v0 }
 0x1c9   : > { %886 = vmatpush3.msra.mxu0 %v458_v61  ;;  %918 = vmatprep.subr.mxu1 %v561_v3 }
 0x1ca   : > { %887 = vmatprep.subr.mxu0 %v457_v63  ;;  %919 = vmatpush3.msra.mxu1 %v561_v3 }
 0x1cb   : > { %888 = vmatpush3.msra.mxu0 %v457_v63  ;;  %920 = vmatprep.subr.mxu1 %v560_v4 }
 0x1cc   : > { %889 = vmatprep.subr.mxu0 %v456_v1  ;;  %921 = vmatpush3.msra.mxu1 %v560_v4 }
 0x1cd   : > { %890 = vmatpush3.msra.mxu0 %v456_v1  ;;  %922 = vmatprep.subr.mxu1 %v559_v5 }
 0x1ce   : > { %892 = vmatmul.mubr.f32.vlgmr.msra.gmra.mxu0 %v455_v2  ;;  %923 = vmatpush3.msra.mxu1 %v559_v5 }
 0x1cf   : > { %924 = vmatprep.subr.mxu1 %v558_v6 }
 0x1d0   : > { %925 = vmatpush3.msra.mxu1 %v558_v6 }
 0x28e   : > { %v893_v8 = vpop.f32.mrf.mxu0 }
 0x28f   : > { %v551_v9 = vadd.f32 %v893_v8, %v815_v7 }
 0x290   : > { %v545_v10 = vpop.f32.mrf.mxu0 }
 0x291   : > { %v546_v11 = vadd.f32 %v815_v7, %v545_v10  ;;  %v555_v13 = vmax.f32 %v551_v9, 0.0 }
 0x293   : > { %v554_v12 = vmax.f32 %v546_v11, 0.0 }
 0x295   : > { %926 = vmatprep.mubr.f32.mxu1 %v554_v12 }
 0x296   : > { %927 = vmatmul.mubr.f32.vlgmr.msra.gmra.mxu1 %v555_v13 }
 0x356   : > { %v928_v15 = vpop.f32.mrf.mxu1 }
 0x357   : > { %v650_v17 = vadd.f32 %v928_v15, %v557_v14  ;;  %656 = sbr.rel (%p816_p6) target bundleno = 872 (0x368), region = 72 }
 0x358   : > { %v640_v18 = vpop.f32.mrf.mxu1 }
 0x359   : > { %652 = vst [vmem:[#allocation3] sm:$0xff] %v650_v17  ;;  %v649_v19 = vadd.f32 %v640_v18, %v556_v16 }
 0x35b   : > { %651 = vst [vmem:[#allocation3 + $0x8] sm:$0xff] %v649_v19 }
 0x35c   : > { %v817_v21 = vld [vmem:[%s1518_s6] ss:$0 sm:$0xff]  ;;  %v669_v25 = vld [vmem:[#allocation4 + $0x8] sm:$0xff] }
 0x35d   : > { %v668_v22 = vld [vmem:[#allocation4] sm:$0xff] }
 0x360   : > { %v658_v24 = vld [vmem:[#allocation3] sm:$0xff] }
 0x361   : > { %v667_v26 = vadd.f32 %v817_v21, %v658_v24 }
 0x362   : > { %v657_v20 = vld [vmem:[#allocation3 + $0x8] sm:$0xff] }
 0x363   : > { %v666_v23 = vadd.f32 %v817_v21, %v657_v20  ;;  %v671_v28 = vadd.f32 %v669_v25, %v667_v26 }
 0x365   : > { %v670_v27 = vadd.f32 %v668_v22, %v666_v23  ;;  %673 = vst [vmem:[#allocation11 + $0x8] sm:$0xff] %v671_v28 }
 0x367   : > { %672 = vst [vmem:[#allocation11] sm:$0xff] %v670_v27 }
 0x368 PF: > { %p964_p13 = scmp.eq.s32.totalorder %s1307_s30, 1  ;;  %s1235_s27 = smov [#allocation11]  }
 0x369   : > { %s683_s19 = sshll.u32 %s1235_s27, 4  ;;  %s684_s19 = int_to_ptr.vmem [resolvable:$true] %s683_s19 }
 0x36a   : > { %s1139_s24 = scalar_lea.vmem %s684_s19, 256  ;;  %p1146_p1 = scmp.lt.s32.totalorder %s684_s19, %s684_s19 }
 0x36b   : > { %p1140_p4 = scmp.ne.s32.totalorder %s684_s19, %s1139_s24  ;;  %p1147_p2 = scmp.lt.s32.totalorder %s1139_s24, %s1139_s24 }
 0x36d   : > { %p1141_p3 = pnand %p1140_p4, %p964_p13  ;;  %p1148_p5 = por %p1147_p2, %p1146_p1 }
 0x36f   : > { %p1142_p0 = pneg %p1141_p3 }
 0x371   : > { %p1149_p11 = pnand %p1148_p5, %p1142_p0 }
 0x373   : > { %1152 = shalt.err (!%p1149_p11)
}
 0x374   : > { %s1236_s22 = smov 128   ;;  %s1237_s13 = smov 8  }
 0x375   : > { %s1543_s10 = sld [smem:[#allocation19_spill]] }
 0x37b   : > { %942 = dma.vmem_to_hbm [thread:$0]  (%p964_p13), %s684_s19, 256, %s1543_s10, [#allocation6], %s1236_s22, %s1236_s22, %s1237_s13  }
 0x37c   : > { %1200 = dma.done.wait (%p964_p13), [#allocation6], 256  }
 0x37d   : > { %1202 = vsyncadd (%p964_p13), [#allocation6], 4294967040 }
 0x37e PF: > { %s20_s29 = sadd.s32 1, %s1225_s29   ;;  %s1544_s23 = sld [smem:[#allocation16_spill]] }
 0x37f   : > { %p17_p10 = scmp.ge.s32.totalorder %s20_s29, 4   ;;  %s1545_s24 = smov %s1209_s25 }
 0x380   : > { %s1546_s25 = smov %s1213_s26  ;;  %s1547_s26 = smov %s1370_s17 }
 0x381   : > { %s1548_s27 = smov %s1221_s28  ;;  %19 = sbr.rel (!%p17_p10) target bundleno = 9 (0x9), region = 116 }
 0x384   : > { %s1549_s28 = smov %s1544_s23 }
 0x386   :  { %699 = vsyncpa [#allocation5], 1 }
 0x387   :  { %701 = vsyncpa [#allocation5 + $0x1], 1 }
 0x388   :  { %702 = vsyncpa [#allocation8], 1 }
 0x389   :  { %703 = vsyncpa [#allocation6], 1 }
 0x38a   :  { %705 = vsyncpa [#allocation6 + $0x1], 1 }

</bundles_post_ra>
